<compile_context>
chip_gen: v5e
topology: v5e:2x2
jax: 0.10.0
libtpu: 0.0.40
codegen_flags: <defaults>
</compile_context>

<pallas_src>
import functools

import jax
import jax.numpy as jnp
import numpy as np
from jax import lax
from jax.experimental import pallas as pl
from jax.experimental.pallas import tpu as pltpu


def _bsc_kernel(x_ref, w12t_ref, b12_ref, wd_ref, bd_ref, cmask_ref,
                o_ref, pad_ref, *, H, W):
    # x_ref   : (N, Cin, H*W)   channel-major images (whole batch in VMEM)
    # w12t_ref: (Cout, Cin)     fused pointwise weight (W2 @ W1)
    # b12_ref : (Cout, 1)       fused pointwise bias
    # wd_ref  : (Cout, 9)       depthwise taps, k = kh*3 + kw
    # bd_ref  : (Cout, 1)       depthwise bias
    # cmask_ref: (2, H*W)       column-edge validity masks (row0: dj=-1, row1: dj=+1)
    # o_ref   : (N, Cout, H*W)  lane-dense output
    # pad_ref : (Cout, (H+2)*W + 2) zero-padded flat row-buffer (VMEM scratch)
    N = x_ref.shape[0]
    HW = H * W
    Cout = o_ref.shape[1]

    w12t = w12t_ref[...]
    b12 = b12_ref[...]
    wd = wd_ref[...]
    bd = bd_ref[...]
    cmask = cmask_ref[...]

    # Zero the padded buffer once; only the interior [base, base+HW) is ever
    # rewritten below, so the halo stays zero for every image.
    pad_ref[...] = jnp.zeros_like(pad_ref)
    base = W + 1                      # flat offset of pixel (0, 0) inside pad_ref

    # Hoist per-tap weights out of the loops: broadcast each per-channel tap to
    # (Cout, HW) and fold in the column-edge mask for dj != 0 taps, so the
    # inner loop is just slice-load * weight + add.
    wtaps = []
    for di in (-1, 0, 1):
        for dj in (-1, 0, 1):
            k = (di + 1) * 3 + (dj + 1)
            wt = jnp.broadcast_to(wd[:, k:k + 1], (Cout, HW))
            if dj == -1:
                wt = wt * cmask[0:1, :]
            elif dj == 1:
                wt = wt * cmask[1:2, :]
            wtaps.append(wt)

    for n in range(N):                # static unroll over the batch block
        xf = x_ref[n].astype(jnp.float32)                          # (Cin, HW)

        # Fused 1x1 convs: single (Cout, Cin) x (Cin, HW) MXU matmul,
        # H*W on the lane axis.
        y = jnp.dot(w12t, xf, preferred_element_type=jnp.float32) + b12

        # Depthwise 3x3, stride 1, pad 1: write y into the zero-padded flat
        # buffer, then accumulate 9 shifted slices scaled by per-channel taps.
        pad_ref[:, base:base + HW] = y

        acc = None
        idx = 0
        for di in (-1, 0, 1):
            for dj in (-1, 0, 1):
                start = base + di * W + dj
                contrib = pad_ref[:, start:start + HW] * wtaps[idx]
                acc = (contrib + bd) if acc is None else (acc + contrib)
                idx += 1

        o_ref[n] = acc.astype(o_ref.dtype)                          # lane-dense store


@jax.jit
def bsc_forward(x_nchw, w1, b1, w2, b2, wd, bd):
    """BSC_S / BSC_S_Ratio forward (pointwise -> pointwise -> depthwise 3x3).

    x_nchw: (N, Cin, H, W)
    w1: (Cmid, Cin)  b1: (Cmid,)   -- first 1x1 conv, torch (out, in) layout
    w2: (Cout, Cmid) b2: (Cout,)   -- second 1x1 conv
    wd: (Cout, 3, 3) bd: (Cout,)   -- depthwise 3x3 conv (torch (C,1,3,3) squeezed)
    Returns (N, Cout, H, W) in NCHW, matching the PyTorch block exactly.
    """
    N, Cin, H, W = x_nchw.shape
    Cout = w2.shape[0]
    HW = H * W

    # Exact algebraic fusion of the two 1x1 convs (no activation between them
    # in BSC_S / BSC_S_Ratio):  W2(W1 x + b1) + b2 = (W2 W1) x + (W2 b1 + b2).
    hi = lax.Precision.HIGHEST
    w12t = jnp.dot(w2, w1, precision=hi).astype(jnp.float32)            # (Cout, Cin)
    b12 = (jnp.dot(w2, b1, precision=hi) + b2).astype(jnp.float32)[:, None]  # (Cout, 1)
    wd_cm = wd.reshape(Cout, 9).astype(jnp.float32)                     # (Cout, 9)
    bd_cm = bd.astype(jnp.float32)[:, None]                             # (Cout, 1)

    # Column-edge validity masks for flat (C, H*W) shifted taps (trace-time
    # constants): row 0 -> tap column shift dj=-1, row 1 -> dj=+1.
    wcol = np.arange(HW, dtype=np.int64) % W
    cmask = jnp.asarray(
        np.stack([(wcol >= 1), (wcol <= W - 2)]).astype(np.float32))    # (2, HW)

    x_flat = x_nchw.reshape(N, Cin, HW)            # free reshape, stays channel-major

    cost = pl.CostEstimate(
        flops=2 * N * HW * Cin * Cout + 2 * 9 * N * HW * Cout,
        transcendentals=0,
        bytes_accessed=4 * (x_flat.size + N * Cout * HW + w12t.size + b12.size
                            + wd_cm.size + bd_cm.size + cmask.size),
    )

    out_flat = pl.pallas_call(
        functools.partial(_bsc_kernel, H=H, W=W),
        out_shape=jax.ShapeDtypeStruct((N, Cout, HW), x_nchw.dtype),
        grid_spec=pltpu.PrefetchScalarGridSpec(
            num_scalar_prefetch=0,
            grid=(1,),                                  # whole batch in one step
            in_specs=[
                pl.BlockSpec((N, Cin, HW), lambda i: (0, 0, 0)),   # x
                pl.BlockSpec((Cout, Cin), lambda i: (0, 0)),       # fused pointwise W
                pl.BlockSpec((Cout, 1), lambda i: (0, 0)),         # fused pointwise b
                pl.BlockSpec((Cout, 9), lambda i: (0, 0)),         # depthwise taps
                pl.BlockSpec((Cout, 1), lambda i: (0, 0)),         # depthwise bias
                pl.BlockSpec((2, HW), lambda i: (0, 0)),           # column masks
            ],
            out_specs=pl.BlockSpec((N, Cout, HW), lambda i: (0, 0, 0)),
            scratch_shapes=[pltpu.VMEM((Cout, (H + 2) * W + 2), jnp.float32)],
        ),
        compiler_params=pltpu.CompilerParams(
            dimension_semantics=("parallel",)),
        cost_estimate=cost,
    )(x_flat, w12t, b12, wd_cm, bd_cm, cmask)

    return out_flat.reshape(N, Cout, H, W)


def _reference_forward(x, w1, b1, w2, b2, wd, bd):
    """Plain-JAX reference mirroring the PyTorch BSC_S/BSC_S_Ratio block."""
    hi = lax.Precision.HIGHEST
    y = jnp.einsum("oi,nihw->nohw", w1, x, precision=hi) + b1[None, :, None, None]
    y = jnp.einsum("oi,nihw->nohw", w2, y, precision=hi) + b2[None, :, None, None]
    C = wd.shape[0]
    y = lax.conv_general_dilated(
        y, wd[:, None, :, :], window_strides=(1, 1), padding=((1, 1), (1, 1)),
        dimension_numbers=("NCHW", "OIHW", "NCHW"),
        feature_group_count=C, precision=hi)
    return y + bd[None, :, None, None]


if __name__ == "__main__":
    # Small shapes consistent with the module's building block.
    N, Cin, H, W = 2, 4, 16, 16
    Cmid = int(Cin * 2.5)        # BSC_S_Ratio mid width (mid_ratio = 2.5)
    Cout = 8

    key = jax.random.PRNGKey(0)
    ks = jax.random.split(key, 7)
    x = jax.random.normal(ks[0], (N, Cin, H, W), jnp.float32)

    # Synthetic parameters in torch conv layout (1x1 weights squeezed to (O, I),
    # depthwise weight squeezed to (C, 3, 3)).
    w1 = jax.random.normal(ks[1], (Cmid, Cin), jnp.float32) * 0.2
    b1 = jax.random.normal(ks[2], (Cmid,), jnp.float32) * 0.1
    w2 = jax.random.normal(ks[3], (Cout, Cmid), jnp.float32) * 0.2
    b2 = jax.random.normal(ks[4], (Cout,), jnp.float32) * 0.1
    wd = jax.random.normal(ks[5], (Cout, 3, 3), jnp.float32) * 0.2
    bd = jax.random.normal(ks[6], (Cout,), jnp.float32) * 0.1

    out = jax.block_until_ready(bsc_forward(x, w1, b1, w2, b2, wd, bd))
    ref = jax.block_until_ready(_reference_forward(x, w1, b1, w2, b2, wd, bd))
    np.testing.assert_allclose(np.asarray(out), np.asarray(ref), rtol=1e-4, atol=1e-4)

    assert out.shape == (N, Cout, H, W)
    print("KERNEL_OK")
</pallas_src>

<mosaic_0001>
module attributes {stable_mosaic.version = 11 : i64} {
  func.func @_bsc_kernel(%arg0: i32, %arg1: memref<2x4x256xf32, #tpu.memory_space<vmem>>, %arg2: memref<8x4xf32, #tpu.memory_space<vmem>>, %arg3: memref<8x1xf32, #tpu.memory_space<vmem>>, %arg4: memref<8x9xf32, #tpu.memory_space<vmem>>, %arg5: memref<8x1xf32, #tpu.memory_space<vmem>>, %arg6: memref<2x256xf32, #tpu.memory_space<vmem>>, %arg7: memref<2x8x256xf32, #tpu.memory_space<vmem>>, %arg8: memref<8x290xf32, #tpu.memory_space<vmem>>) attributes {dimension_semantics = [#tpu.dimension_semantics<parallel>], iteration_bounds = array<i64: 1>, scalar_prefetch = 0 : i64, scratch_operands = 1 : i64, tpu.core_type = #tpu.core_type<tc>, window_params = [{pipeline_mode = #tpu.pipeline_mode<synchronous>, transform_indices = @transform_0, window_bounds = array<i64: 2, 4, 256>}, {pipeline_mode = #tpu.pipeline_mode<synchronous>, transform_indices = @transform_1, window_bounds = array<i64: 8, 4>}, {pipeline_mode = #tpu.pipeline_mode<synchronous>, transform_indices = @transform_2, window_bounds = array<i64: 8, 1>}, {pipeline_mode = #tpu.pipeline_mode<synchronous>, transform_indices = @transform_3, window_bounds = array<i64: 8, 9>}, {pipeline_mode = #tpu.pipeline_mode<synchronous>, transform_indices = @transform_4, window_bounds = array<i64: 8, 1>}, {pipeline_mode = #tpu.pipeline_mode<synchronous>, transform_indices = @transform_5, window_bounds = array<i64: 2, 256>}, {pipeline_mode = #tpu.pipeline_mode<synchronous>, transform_indices = @transform_6, window_bounds = array<i64: 2, 8, 256>}]} {
    %c0 = arith.constant 0 : index
    %c0_0 = arith.constant 0 : index
    %0 = vector.load %arg2[%c0, %c0_0] : memref<8x4xf32, #tpu.memory_space<vmem>>, vector<8x4xf32>
    %c0_1 = arith.constant 0 : index
    %c0_2 = arith.constant 0 : index
    %1 = vector.load %arg3[%c0_1, %c0_2] : memref<8x1xf32, #tpu.memory_space<vmem>>, vector<8x1xf32>
    %c0_3 = arith.constant 0 : index
    %c0_4 = arith.constant 0 : index
    %2 = vector.load %arg4[%c0_3, %c0_4] : memref<8x9xf32, #tpu.memory_space<vmem>>, vector<8x9xf32>
    %c0_5 = arith.constant 0 : index
    %c0_6 = arith.constant 0 : index
    %3 = vector.load %arg5[%c0_5, %c0_6] : memref<8x1xf32, #tpu.memory_space<vmem>>, vector<8x1xf32>
    %c0_7 = arith.constant 0 : index
    %c0_8 = arith.constant 0 : index
    %4 = vector.load %arg6[%c0_7, %c0_8] : memref<2x256xf32, #tpu.memory_space<vmem>>, vector<2x256xf32>
    %cst = arith.constant 0.000000e+00 : f32
    %5 = vector.broadcast %cst : f32 to vector<8x290xf32>
    %c0_9 = arith.constant 0 : index
    %c0_10 = arith.constant 0 : index
    %6 = vector.load %arg8[%c0_9, %c0_10] : memref<8x290xf32, #tpu.memory_space<vmem>>, vector<8x290xf32>
    tpu.vector_store %arg8[%c0_9, %c0_10], %5 {strides = array<i32>} : memref<8x290xf32, #tpu.memory_space<vmem>>, vector<8x290xf32>,
    %7 = vector.extract_strided_slice %2 {offsets = [0, 0], sizes = [8, 1], strides = [1, 1]} : vector<8x9xf32> to vector<8x1xf32>
    %8 = vector.shape_cast %7 : vector<8x1xf32> to vector<8x1xf32>
    %9 = vector.broadcast %8 : vector<8x1xf32> to vector<8x256xf32>
    %10 = vector.extract_strided_slice %4 {offsets = [0, 0], sizes = [1, 256], strides = [1, 1]} : vector<2x256xf32> to vector<1x256xf32>
    %11 = vector.broadcast %10 : vector<1x256xf32> to vector<8x256xf32>
    %12 = arith.mulf %9, %11 : vector<8x256xf32>
    %13 = vector.extract_strided_slice %2 {offsets = [0, 1], sizes = [8, 1], strides = [1, 1]} : vector<8x9xf32> to vector<8x1xf32>
    %14 = vector.shape_cast %13 : vector<8x1xf32> to vector<8x1xf32>
    %15 = vector.broadcast %14 : vector<8x1xf32> to vector<8x256xf32>
    %16 = vector.extract_strided_slice %2 {offsets = [0, 2], sizes = [8, 1], strides = [1, 1]} : vector<8x9xf32> to vector<8x1xf32>
    %17 = vector.shape_cast %16 : vector<8x1xf32> to vector<8x1xf32>
    %18 = vector.broadcast %17 : vector<8x1xf32> to vector<8x256xf32>
    %19 = vector.extract_strided_slice %4 {offsets = [1, 0], sizes = [1, 256], strides = [1, 1]} : vector<2x256xf32> to vector<1x256xf32>
    %20 = vector.broadcast %19 : vector<1x256xf32> to vector<8x256xf32>
    %21 = arith.mulf %18, %20 : vector<8x256xf32>
    %22 = vector.extract_strided_slice %2 {offsets = [0, 3], sizes = [8, 1], strides = [1, 1]} : vector<8x9xf32> to vector<8x1xf32>
    %23 = vector.shape_cast %22 : vector<8x1xf32> to vector<8x1xf32>
    %24 = vector.broadcast %23 : vector<8x1xf32> to vector<8x256xf32>
    %25 = vector.extract_strided_slice %4 {offsets = [0, 0], sizes = [1, 256], strides = [1, 1]} : vector<2x256xf32> to vector<1x256xf32>
    %26 = vector.broadcast %25 : vector<1x256xf32> to vector<8x256xf32>
    %27 = arith.mulf %24, %26 : vector<8x256xf32>
    %28 = vector.extract_strided_slice %2 {offsets = [0, 4], sizes = [8, 1], strides = [1, 1]} : vector<8x9xf32> to vector<8x1xf32>
    %29 = vector.shape_cast %28 : vector<8x1xf32> to vector<8x1xf32>
    %30 = vector.broadcast %29 : vector<8x1xf32> to vector<8x256xf32>
    %31 = vector.extract_strided_slice %2 {offsets = [0, 5], sizes = [8, 1], strides = [1, 1]} : vector<8x9xf32> to vector<8x1xf32>
    %32 = vector.shape_cast %31 : vector<8x1xf32> to vector<8x1xf32>
    %33 = vector.broadcast %32 : vector<8x1xf32> to vector<8x256xf32>
    %34 = vector.extract_strided_slice %4 {offsets = [1, 0], sizes = [1, 256], strides = [1, 1]} : vector<2x256xf32> to vector<1x256xf32>
    %35 = vector.broadcast %34 : vector<1x256xf32> to vector<8x256xf32>
    %36 = arith.mulf %33, %35 : vector<8x256xf32>
    %37 = vector.extract_strided_slice %2 {offsets = [0, 6], sizes = [8, 1], strides = [1, 1]} : vector<8x9xf32> to vector<8x1xf32>
    %38 = vector.shape_cast %37 : vector<8x1xf32> to vector<8x1xf32>
    %39 = vector.broadcast %38 : vector<8x1xf32> to vector<8x256xf32>
    %40 = vector.extract_strided_slice %4 {offsets = [0, 0], sizes = [1, 256], strides = [1, 1]} : vector<2x256xf32> to vector<1x256xf32>
    %41 = vector.broadcast %40 : vector<1x256xf32> to vector<8x256xf32>
    %42 = arith.mulf %39, %41 : vector<8x256xf32>
    %43 = vector.extract_strided_slice %2 {offsets = [0, 7], sizes = [8, 1], strides = [1, 1]} : vector<8x9xf32> to vector<8x1xf32>
    %44 = vector.shape_cast %43 : vector<8x1xf32> to vector<8x1xf32>
    %45 = vector.broadcast %44 : vector<8x1xf32> to vector<8x256xf32>
    %46 = vector.extract_strided_slice %2 {offsets = [0, 8], sizes = [8, 1], strides = [1, 1]} : vector<8x9xf32> to vector<8x1xf32>
    %47 = vector.shape_cast %46 : vector<8x1xf32> to vector<8x1xf32>
    %48 = vector.broadcast %47 : vector<8x1xf32> to vector<8x256xf32>
    %49 = vector.extract_strided_slice %4 {offsets = [1, 0], sizes = [1, 256], strides = [1, 1]} : vector<2x256xf32> to vector<1x256xf32>
    %50 = vector.broadcast %49 : vector<1x256xf32> to vector<8x256xf32>
    %51 = arith.mulf %48, %50 : vector<8x256xf32>
    %c0_11 = arith.constant 0 : index
    %c0_12 = arith.constant 0 : index
    %c0_13 = arith.constant 0 : index
    %52 = vector.load %arg1[%c0_11, %c0_12, %c0_13] : memref<2x4x256xf32, #tpu.memory_space<vmem>>, vector<1x4x256xf32>
    %53 = vector.shape_cast %52 : vector<1x4x256xf32> to vector<4x256xf32>
    %cst_14 = arith.constant dense<0.000000e+00> : vector<8x256xf32>
    %54 = tpu.matmul %0, %53, %cst_14 {dimension_numbers = #tpu.dot_dimension_numbers<[1], [0], [0], [1], [0, 0, 1, 1], [], []>} : vector<8x4xf32>, vector<4x256xf32>, vector<8x256xf32> -> vector<8x256xf32>
    %55 = vector.broadcast %1 : vector<8x1xf32> to vector<8x256xf32>
    %56 = arith.addf %54, %55 : vector<8x256xf32>
    %c0_15 = arith.constant 0 : index
    %c17 = arith.constant 17 : index
    %57 = vector.load %arg8[%c0_15, %c17] : memref<8x290xf32, #tpu.memory_space<vmem>>, vector<8x256xf32>
    tpu.vector_store %arg8[%c0_15, %c17], %56 {strides = array<i32>} : memref<8x290xf32, #tpu.memory_space<vmem>>, vector<8x256xf32>,
    %c0_16 = arith.constant 0 : index
    %c0_17 = arith.constant 0 : index
    %58 = vector.load %arg8[%c0_16, %c0_17] : memref<8x290xf32, #tpu.memory_space<vmem>>, vector<8x256xf32>
    %59 = arith.mulf %58, %12 : vector<8x256xf32>
    %60 = vector.broadcast %3 : vector<8x1xf32> to vector<8x256xf32>
    %61 = arith.addf %59, %60 : vector<8x256xf32>
    %c0_18 = arith.constant 0 : index
    %c1 = arith.constant 1 : index
    %62 = vector.load %arg8[%c0_18, %c1] : memref<8x290xf32, #tpu.memory_space<vmem>>, vector<8x256xf32>
    %63 = arith.mulf %62, %15 : vector<8x256xf32>
    %64 = arith.addf %61, %63 : vector<8x256xf32>
    %c0_19 = arith.constant 0 : index
    %c2 = arith.constant 2 : index
    %65 = vector.load %arg8[%c0_19, %c2] : memref<8x290xf32, #tpu.memory_space<vmem>>, vector<8x256xf32>
    %66 = arith.mulf %65, %21 : vector<8x256xf32>
    %67 = arith.addf %64, %66 : vector<8x256xf32>
    %c0_20 = arith.constant 0 : index
    %c16 = arith.constant 16 : index
    %68 = vector.load %arg8[%c0_20, %c16] : memref<8x290xf32, #tpu.memory_space<vmem>>, vector<8x256xf32>
    %69 = arith.mulf %68, %27 : vector<8x256xf32>
    %70 = arith.addf %67, %69 : vector<8x256xf32>
    %c0_21 = arith.constant 0 : index
    %c17_22 = arith.constant 17 : index
    %71 = vector.load %arg8[%c0_21, %c17_22] : memref<8x290xf32, #tpu.memory_space<vmem>>, vector<8x256xf32>
    %72 = arith.mulf %71, %30 : vector<8x256xf32>
    %73 = arith.addf %70, %72 : vector<8x256xf32>
    %c0_23 = arith.constant 0 : index
    %c18 = arith.constant 18 : index
    %74 = vector.load %arg8[%c0_23, %c18] : memref<8x290xf32, #tpu.memory_space<vmem>>, vector<8x256xf32>
    %75 = arith.mulf %74, %36 : vector<8x256xf32>
    %76 = arith.addf %73, %75 : vector<8x256xf32>
    %c0_24 = arith.constant 0 : index
    %c32 = arith.constant 32 : index
    %77 = vector.load %arg8[%c0_24, %c32] : memref<8x290xf32, #tpu.memory_space<vmem>>, vector<8x256xf32>
    %78 = arith.mulf %77, %42 : vector<8x256xf32>
    %79 = arith.addf %76, %78 : vector<8x256xf32>
    %c0_25 = arith.constant 0 : index
    %c33 = arith.constant 33 : index
    %80 = vector.load %arg8[%c0_25, %c33] : memref<8x290xf32, #tpu.memory_space<vmem>>, vector<8x256xf32>
    %81 = arith.mulf %80, %45 : vector<8x256xf32>
    %82 = arith.addf %79, %81 : vector<8x256xf32>
    %c0_26 = arith.constant 0 : index
    %c34 = arith.constant 34 : index
    %83 = vector.load %arg8[%c0_26, %c34] : memref<8x290xf32, #tpu.memory_space<vmem>>, vector<8x256xf32>
    %84 = arith.mulf %83, %51 : vector<8x256xf32>
    %85 = arith.addf %82, %84 : vector<8x256xf32>
    %c0_27 = arith.constant 0 : index
    %c0_28 = arith.constant 0 : index
    %c0_29 = arith.constant 0 : index
    %86 = vector.load %arg7[%c0_27, %c0_28, %c0_29] : memref<2x8x256xf32, #tpu.memory_space<vmem>>, vector<1x8x256xf32>
    %87 = vector.shape_cast %86 : vector<1x8x256xf32> to vector<8x256xf32>
    %88 = vector.shape_cast %85 : vector<8x256xf32> to vector<1x8x256xf32>
    tpu.vector_store %arg7[%c0_27, %c0_28, %c0_29], %88 {strides = array<i32>} : memref<2x8x256xf32, #tpu.memory_space<vmem>>, vector<1x8x256xf32>,
    %c1_30 = arith.constant 1 : index
    %c0_31 = arith.constant 0 : index
    %c0_32 = arith.constant 0 : index
    %89 = vector.load %arg1[%c1_30, %c0_31, %c0_32] : memref<2x4x256xf32, #tpu.memory_space<vmem>>, vector<1x4x256xf32>
    %90 = vector.shape_cast %89 : vector<1x4x256xf32> to vector<4x256xf32>
    %cst_33 = arith.constant dense<0.000000e+00> : vector<8x256xf32>
    %91 = tpu.matmul %0, %90, %cst_33 {dimension_numbers = #tpu.dot_dimension_numbers<[1], [0], [0], [1], [0, 0, 1, 1], [], []>} : vector<8x4xf32>, vector<4x256xf32>, vector<8x256xf32> -> vector<8x256xf32>
    %92 = vector.broadcast %1 : vector<8x1xf32> to vector<8x256xf32>
    %93 = arith.addf %91, %92 : vector<8x256xf32>
    %c0_34 = arith.constant 0 : index
    %c17_35 = arith.constant 17 : index
    %94 = vector.load %arg8[%c0_34, %c17_35] : memref<8x290xf32, #tpu.memory_space<vmem>>, vector<8x256xf32>
    tpu.vector_store %arg8[%c0_34, %c17_35], %93 {strides = array<i32>} : memref<8x290xf32, #tpu.memory_space<vmem>>, vector<8x256xf32>,
    %c0_36 = arith.constant 0 : index
    %c0_37 = arith.constant 0 : index
    %95 = vector.load %arg8[%c0_36, %c0_37] : memref<8x290xf32, #tpu.memory_space<vmem>>, vector<8x256xf32>
    %96 = arith.mulf %95, %12 : vector<8x256xf32>
    %97 = vector.broadcast %3 : vector<8x1xf32> to vector<8x256xf32>
    %98 = arith.addf %96, %97 : vector<8x256xf32>
    %c0_38 = arith.constant 0 : index
    %c1_39 = arith.constant 1 : index
    %99 = vector.load %arg8[%c0_38, %c1_39] : memref<8x290xf32, #tpu.memory_space<vmem>>, vector<8x256xf32>
    %100 = arith.mulf %99, %15 : vector<8x256xf32>
    %101 = arith.addf %98, %100 : vector<8x256xf32>
    %c0_40 = arith.constant 0 : index
    %c2_41 = arith.constant 2 : index
    %102 = vector.load %arg8[%c0_40, %c2_41] : memref<8x290xf32, #tpu.memory_space<vmem>>, vector<8x256xf32>
    %103 = arith.mulf %102, %21 : vector<8x256xf32>
    %104 = arith.addf %101, %103 : vector<8x256xf32>
    %c0_42 = arith.constant 0 : index
    %c16_43 = arith.constant 16 : index
    %105 = vector.load %arg8[%c0_42, %c16_43] : memref<8x290xf32, #tpu.memory_space<vmem>>, vector<8x256xf32>
    %106 = arith.mulf %105, %27 : vector<8x256xf32>
    %107 = arith.addf %104, %106 : vector<8x256xf32>
    %c0_44 = arith.constant 0 : index
    %c17_45 = arith.constant 17 : index
    %108 = vector.load %arg8[%c0_44, %c17_45] : memref<8x290xf32, #tpu.memory_space<vmem>>, vector<8x256xf32>
    %109 = arith.mulf %108, %30 : vector<8x256xf32>
    %110 = arith.addf %107, %109 : vector<8x256xf32>
    %c0_46 = arith.constant 0 : index
    %c18_47 = arith.constant 18 : index
    %111 = vector.load %arg8[%c0_46, %c18_47] : memref<8x290xf32, #tpu.memory_space<vmem>>, vector<8x256xf32>
    %112 = arith.mulf %111, %36 : vector<8x256xf32>
    %113 = arith.addf %110, %112 : vector<8x256xf32>
    %c0_48 = arith.constant 0 : index
    %c32_49 = arith.constant 32 : index
    %114 = vector.load %arg8[%c0_48, %c32_49] : memref<8x290xf32, #tpu.memory_space<vmem>>, vector<8x256xf32>
    %115 = arith.mulf %114, %42 : vector<8x256xf32>
    %116 = arith.addf %113, %115 : vector<8x256xf32>
    %c0_50 = arith.constant 0 : index
    %c33_51 = arith.constant 33 : index
    %117 = vector.load %arg8[%c0_50, %c33_51] : memref<8x290xf32, #tpu.memory_space<vmem>>, vector<8x256xf32>
    %118 = arith.mulf %117, %45 : vector<8x256xf32>
    %119 = arith.addf %116, %118 : vector<8x256xf32>
    %c0_52 = arith.constant 0 : index
    %c34_53 = arith.constant 34 : index
    %120 = vector.load %arg8[%c0_52, %c34_53] : memref<8x290xf32, #tpu.memory_space<vmem>>, vector<8x256xf32>
    %121 = arith.mulf %120, %51 : vector<8x256xf32>
    %122 = arith.addf %119, %121 : vector<8x256xf32>
    %c1_54 = arith.constant 1 : index
    %c0_55 = arith.constant 0 : index
    %c0_56 = arith.constant 0 : index
    %123 = vector.load %arg7[%c1_54, %c0_55, %c0_56] : memref<2x8x256xf32, #tpu.memory_space<vmem>>, vector<1x8x256xf32>
    %124 = vector.shape_cast %123 : vector<1x8x256xf32> to vector<8x256xf32>
    %125 = vector.shape_cast %122 : vector<8x256xf32> to vector<1x8x256xf32>
    tpu.vector_store %arg7[%c1_54, %c0_55, %c0_56], %125 {strides = array<i32>} : memref<2x8x256xf32, #tpu.memory_space<vmem>>, vector<1x8x256xf32>,
    return
  }
  func.func @transform_0(%arg0: i32) -> (i32, i32, i32) {
    %c0_i32 = arith.constant 0 : i32
    %c0_i32_0 = arith.constant 0 : i32
    %c0_i32_1 = arith.constant 0 : i32
    %c0_i32_2 = arith.constant 0 : i32
    return %c0_i32, %c0_i32_0, %c0_i32_1 : i32, i32, i32
  }
  func.func @transform_1(%arg0: i32) -> (i32, i32) {
    %c0_i32 = arith.constant 0 : i32
    %c0_i32_0 = arith.constant 0 : i32
    %c0_i32_1 = arith.constant 0 : i32
    return %c0_i32, %c0_i32_0 : i32, i32
  }
  func.func @transform_2(%arg0: i32) -> (i32, i32) {
    %c0_i32 = arith.constant 0 : i32
    %c0_i32_0 = arith.constant 0 : i32
    %c0_i32_1 = arith.constant 0 : i32
    return %c0_i32, %c0_i32_0 : i32, i32
  }
  func.func @transform_3(%arg0: i32) -> (i32, i32) {
    %c0_i32 = arith.constant 0 : i32
    %c0_i32_0 = arith.constant 0 : i32
    %c0_i32_1 = arith.constant 0 : i32
    return %c0_i32, %c0_i32_0 : i32, i32
  }
  func.func @transform_4(%arg0: i32) -> (i32, i32) {
    %c0_i32 = arith.constant 0 : i32
    %c0_i32_0 = arith.constant 0 : i32
    %c0_i32_1 = arith.constant 0 : i32
    return %c0_i32, %c0_i32_0 : i32, i32
  }
  func.func @transform_5(%arg0: i32) -> (i32, i32) {
    %c0_i32 = arith.constant 0 : i32
    %c0_i32_0 = arith.constant 0 : i32
    %c0_i32_1 = arith.constant 0 : i32
    return %c0_i32, %c0_i32_0 : i32, i32
  }
  func.func @transform_6(%arg0: i32) -> (i32, i32, i32) {
    %c0_i32 = arith.constant 0 : i32
    %c0_i32_0 = arith.constant 0 : i32
    %c0_i32_1 = arith.constant 0 : i32
    %c0_i32_2 = arith.constant 0 : i32
    return %c0_i32, %c0_i32_0, %c0_i32_1 : i32, i32, i32
  }
}

</mosaic_0001>

<bundles_post_ra>
// kernel: bsc_forward.1
= control target key start
LH: loop header
LB: loop body
LE: loop exit
PB: predicated region body
PF: predicated region fallthrough
CT: control target
= control target key end

     0   :  { %v658_v0 = vmov 2   ;;  %v659_v2 = vmov 0   ;;  %v660_v4 = vmov 4   ;;  %v661_v8 = vmov 3   ;;  %s670_s8 = smov 32   ;;  %s671_s9 = smov 34   ;;  %s1001_s3 = inlined_call_operand.vmem [shape: f32[8,9], index: 3, kind: input, shape index: {}]   ;;  %s1002_s0 = inlined_call_operand.vmem [shape: f32[2,4,256], index: 0, kind: input, shape index: {}]   ;;  %s1003_s1 = inlined_call_operand.vmem [shape: f32[8,4], index: 1, kind: input, shape index: {}]   ;;  %s1004_s2 = inlined_call_operand.vmem [shape: f32[8,1], index: 2, kind: input, shape index: {}]   ;;  %s1005_s4 = inlined_call_operand.vmem [shape: f32[8,1], index: 4, kind: input, shape index: {}]   ;;  %s1006_s5 = inlined_call_operand.vmem [shape: f32[2,256], index: 5, kind: input, shape index: {}]   ;;  %s1007_s6 = inlined_call_operand.vmem [shape: f32[2,8,256], index: 6, kind: output, shape index: {}]  }
   0x1   :  { %648 = vset.pattern.permute.xlu1 %v658_v0  ;;  %v25_v1 = vld [vmem:[%s1001_s3] sm:$0xff]  ;;  %646 = vset.pattern.permute.xlu0 %v659_v2  ;;  %v615_v5 = vld [vmem:[%s1002_s0 + $0x8] sm:$0xff]  ;;  %v662_v9 = vmov 1   ;;  %vm108_vm0 = vcmask 1043456   ;;  %vm104_vm1 = vcmask 31744   ;;  %v663_v11 = vmov 5  }
   0x2   :  { %v94_v3 = vld [vmem:[%s1002_s0] sm:$0xff]  ;;  %51 = vperm.xlu1 %648, %v25_v1   ;;  %34 = vperm.xlu0 %646, %v25_v1   ;;  %v664_v14 = vmov 6   ;;  %v665_v15 = vmov 8   ;;  %v666_v16 = vmov 7   ;;  %s672_s10 = smov 17   ;;  %v673_v59 = vmov 0.0  }
   0x3   :  { %101 = vst [vmem:[#allocation1] ss:$2 sm:$0xff] %v94_v3  ;;  %650 = vset.pattern.permute.xlu2 %v660_v4  ;;  %v23_v10 = vld [vmem:[%s1003_s1] sm:$0xff]  ;;  %vm30_vm2 = vcmask 277504   ;;  %vm286_vm3 = vcmask 146432   ;;  %vm164_vm4 = vcmask 1047688  }
   0x4   :  { %69 = vperm.xlu2 %650, %v25_v1   ;;  %v24_v17 = vld [vmem:[%s1004_s2] sm:$0xff]  ;;  %s667_s2 = smov 2   ;;  %28 = vst [vmem:[#allocation2] sm:$0xff] %v673_v59  ;;  %s674_s11 = smov 127   ;;  %vm237_vm5 = vcmask 130048   ;;  %vm159_vm6 = vcmask 138240  }
   0x5   :  { %v26_v18 = vld [vmem:[%s1005_s4] sm:$0xff]  ;;  %s668_s4 = smov 18   ;;  %31 = vst.msk [vmem:[#allocation2 + $0x10] sm:$0xff] %vm30_vm2, %v673_v59  ;;  %vm207_vm7 = vcmask 15360   ;;  %vm316_vm8 = vcmask 261120   ;;  %s675_s12 = smov 126  }
   0x6   :  { %v27_v19 = vld [vmem:[%s1006_s5] sm:$0xf]  ;;  %s669_s5 = smov 16   ;;  %s676_s13 = smov 112   ;;  %vm194_vm9 = vcmask 1039360   ;;  %vm224_vm10 = vcmask 1031168  }
   0x7   :  { %v54_v20 = vperm.slane %v27_v19, 1  ;;  %v55_v21 = vperm.slane %v27_v19, 3  ;;  %v38_v22 = vperm.slane %v27_v19, 0  ;;  %v39_v23 = vperm.slane %v27_v19, 2  ;;  %s677_s14 = smov 111   ;;  %s678_s15 = smov 110  }
   0x8   :  { %s679_s16 = smov 95   ;;  %s680_s17 = smov 96   ;;  %vm254_vm11 = vcmask 916480   ;;  %vm273_vm12 = vcmask 908288   ;;  %vm303_vm13 = vcmask 900096   ;;  %vm333_vm14 = vcmask 785408  }
   0x9   :  { %v58_v25 = vperm.slane %v54_v20, 1  ;;  %v59_v26 = vperm.slane %v55_v21, 1  ;;  %v42_v27 = vperm.slane %v38_v22, 0  ;;  %v43_v28 = vperm.slane %v39_v23, 0  ;;  %s681_s18 = smov 94  }
   0xa   :  { %v102_v6 = vld.sshfl [vmem:[#allocation1] sm:$0xff pattern:$0x75316420]  ;;  %v103_v7 = vld.sshfl [vmem:[#allocation1 + $0x8] sm:$0xff pattern:$0x75316420]  ;;  %649 = vset.pattern.permute.xlu1 %v661_v8  ;;  %647 = vset.pattern.permute.xlu0 %v662_v9 }
   0xb   :  { %393 = vst [vmem:[#allocation1] ss:$2 sm:$0xff] %v615_v5  ;;  %63 = vperm.xlu1 %649, %v25_v1   ;;  %47 = vperm.xlu0 %647, %v25_v1   ;;  %vm352_vm15 = vcmask 777216  }
   0xc   :  { %611 = vmatpush.msk.msra.mxu0 %vm108_vm0, %v102_v6  ;;  %613 = vmatpush.msk.msra.mxu1 %vm108_vm0, %v103_v7 }
   0xd   :  { %612 = vmatmul.msk.f32.vlgmr.msra.gmra.mxu0 %vm104_vm1, %v23_v10  ;;  %614 = vmatmul.msk.f32.vlgmr.msra.gmra.mxu1 %vm104_vm1, %v23_v10 }
   0xe   :  { %651 = vset.pattern.permute.xlu2 %v663_v11 }
   0xf   :  { %73 = vperm.xlu2 %651, %v25_v1  }
  0x12   :  { %v394_v12 = vld.sshfl [vmem:[#allocation1] sm:$0xff pattern:$0x75316420]  ;;  %v395_v13 = vld.sshfl [vmem:[#allocation1 + $0x8] sm:$0xff pattern:$0x75316420] }
  0x13   :  { %616 = vmatpush.msk.msra.mxu2 %vm108_vm0, %v394_v12  ;;  %618 = vmatpush.msk.msra.mxu3 %vm108_vm0, %v395_v13  ;;  %vm381_vm0 = vcmask 769024  }
  0x14   :  { %652 = vset.pattern.permute.xlu1 %v664_v14  ;;  %617 = vmatmul.msk.f32.vlgmr.msra.gmra.mxu2 %vm104_vm1, %v23_v10 }
  0x15   :  { %619 = vmatmul.msk.f32.vlgmr.msra.gmra.mxu3 %vm104_vm1, %v23_v10  ;;  %79 = vperm.xlu1 %652, %v25_v1  }
  0x16   :  { %654 = vset.pattern.permute.xlu0 %v665_v15 }
  0x17   :  { %89 = vperm.xlu0 %654, %v25_v1   ;;  %653 = vset.pattern.permute.xlu2 %v666_v16 }
  0x18   :  { %85 = vperm.xlu2 %653, %v25_v1  }
  0x1d   :  { %655 = vset.pattern.permute.xlu1 %v659_v2 }
  0x1e   :  { %97 = vperm.xlu1 %655, %v24_v17  }
  0x1f   :  { %657 = vset.pattern.permute.xlu0 %v659_v2 }
  0x20   :  { %656 = vset.pattern.permute.xlu2 %v659_v2 }
  0x21   :  { %174 = vperm.xlu2 %656, %v26_v18  }
  0x5e   :  { %v738_v24 = vpop.permute.xlu2 %69 }
  0x69   :  { %v74_v35 = vpop.permute.xlu2 %73 }
  0x6a   :  { %v76_v36 = vmul.f32 %v74_v35, %v58_v25  ;;  %v77_v41 = vmul.f32 %v74_v35, %v59_v26 }
  0x72   :  { %v746_v57 = vpop.permute.xlu2 %85 }
  0x74   :  { %v52_v29 = vpop.permute.xlu1 %51  ;;  %v35_v30 = vpop.permute.xlu0 %34 }
  0x75   :  { %v60_v31 = vmul.f32 %v58_v25, %v52_v29  ;;  %v61_v32 = vmul.f32 %v59_v26, %v52_v29  ;;  %v740_v33 = vmul.f32 %v42_v27, %v35_v30  ;;  %v742_v34 = vmul.f32 %v43_v28, %v35_v30 }
  0x77   :  { %203 = vrot.lane.b32.xlu0 %v60_v31, %s667_s2  ;;  %205 = vrot.lane.b32.xlu1 %v61_v32, %s667_s2 }
  0x7b   :  { %v748_v58 = vpop.permute.xlu2 %174 }
  0x7d   :  { %v64_v37 = vpop.permute.xlu1 %63  ;;  %v744_v40 = vpop.permute.xlu0 %47 }
  0x7e   :  { %v66_v38 = vmul.f32 %v64_v37, %v42_v27  ;;  %v67_v39 = vmul.f32 %v64_v37, %v43_v28 }
  0x7f   :  { %282 = vrot.lane.b32.xlu1 %v76_v36, %s668_s4 }
  0x80   :  { %233 = vrot.lane.b32.xlu2 %v66_v38, %s669_s5  ;;  %235 = vrot.lane.b32.xlu0 %v67_v39, %s669_s5 }
  0x87   :  { %v80_v42 = vpop.permute.xlu1 %79 }
  0x88   :  { %v82_v43 = vmul.f32 %v80_v42, %v42_v27  ;;  %v83_v44 = vmul.f32 %v80_v42, %v43_v28  ;;  %284 = vrot.lane.b32.xlu2 %v77_v41, %s668_s4 }
  0x89   :  { %v90_v45 = vpop.permute.xlu0 %89 }
  0x8a   :  { %312 = vrot.lane.b32.xlu0 %v82_v43, %s670_s8  ;;  %314 = vrot.lane.b32.xlu1 %v83_v44, %s670_s8  ;;  %v93_v46 = vmul.f32 %v90_v45, %v59_v26  ;;  %v92_v47 = vmul.f32 %v90_v45, %v58_v25  ;;  %v130_v49 = vpop.f32.mrf.mxu0  ;;  %v150_v50 = vpop.f32.mrf.mxu1 }
  0x90   :  { %363 = vrot.lane.b32.xlu2 %v93_v46, %s671_s9  ;;  %v98_v48 = vpop.permute.xlu1 %97 }
  0x91   :  { %v131_v51 = vadd.f32 %v130_v49, %v98_v48  ;;  %v151_v52 = vadd.f32 %v150_v50, %v98_v48 }
  0x92   :  { %361 = vrot.lane.b32.xlu1 %v92_v47, %s671_s9 }
  0x97   :  { %v417_v54 = vpop.f32.mrf.mxu2 }
  0x98   :  { %155 = vrot.lane.b32.xlu2 %v131_v51, %s672_s10  ;;  %v437_v53 = vpop.f32.mrf.mxu3  ;;  %v418_v56 = vadd.f32 %v417_v54, %v98_v48 }
  0x99   :  { %v438_v55 = vadd.f32 %v437_v53, %v98_v48 }
  0x9a   :  { %157 = vrot.lane.b32.xlu1 %v151_v52, %s672_s10 }
  0xa0   :  { %444 = vrot.lane.b32.xlu2 %v438_v55, %s672_s10 }
  0xa2   :  { %442 = vrot.lane.b32.xlu1 %v418_v56, %s672_s10 }
  0xda   :  { %v750_v60 = vpop.permute.xlu2 %233 }
  0xe2   :  { %v753_v61 = vpop.permute.xlu2 %284 }
  0xe9   :  { %v755_v62 = vpop.permute.xlu1 %205  ;;  %v764_v3 = vpop.permute.xlu0 %203 }
  0xea   :  { %v757_v63 = vpop.permute.xlu2 %363  ;;  %v794_v15 = vsel %vm207_vm7, %v764_v3, %v755_v62 }
  0xf1   :  { %v759_v0 = vpop.permute.xlu1 %282 }
  0xf2   :  { %v287_v1 = vsel %vm286_vm3, %v759_v0, %v753_v61  ;;  %v156_v2 = vpop.permute.xlu2 %155  ;;  %v777_v8 = vpop.permute.xlu0 %235 }
  0xf3   :  { %165 = vst.msk [vmem:[#allocation2] sm:$0xff] %vm164_vm4, %v156_v2  ;;  %v238_v13 = vsel %vm237_vm5, %v750_v60, %v777_v8 }
  0xfa   :  { %v766_v4 = vld [vmem:[#allocation2] sm:$0xff]  ;;  %v445_v23 = vpop.permute.xlu2 %444 }
  0xfb   :  { %v182_v6 = vmul.f32 %v766_v4, %v744_v40  ;;  %v775_v7 = vmul.f32 %v766_v4, %v740_v33  ;;  %v242_v38 = vmul.f32 %v750_v60, %v766_v4  ;;  %v212_v39 = vmul.f32 %v764_v3, %v766_v4 }
  0xfc   :  { %v768_v5 = vpop.permute.xlu1 %314  ;;  %v784_v11 = vpop.permute.xlu0 %312  ;;  %v261_v43 = vmul.f32 %v766_v4, %v738_v24  ;;  %v291_v45 = vmul.f32 %v759_v0, %v766_v4 }
  0xfd   :  { %188 = vrot.lane.b32.xlu0 %v182_v6, %s674_s11  ;;  %v317_v16 = vsel %vm316_vm8, %v784_v11, %v768_v5  ;;  %v321_v46 = vmul.f32 %v784_v11, %v766_v4 }
 0x104   :  { %v779_v9 = vpop.permute.xlu1 %361 }
 0x105   :  { %v365_v10 = vsel %vm30_vm2, %v779_v9, %v757_v63  ;;  %v369_v51 = vmul.f32 %v779_v9, %v766_v4 }
 0x10c   :  { %v158_v12 = vpop.permute.xlu1 %157 }
 0x10d   :  { %v789_v14 = vsel %vm159_vm6, %v156_v2, %v158_v12  ;;  %167 = vst.msk [vmem:[#allocation2 + $0x10] sm:$0xff] %vm159_vm6, %v158_v12 }
 0x10e   :  { %v243_v17 = vmul.f32 %v238_v13, %v789_v14  ;;  %v292_v18 = vmul.f32 %v287_v1, %v789_v14  ;;  %v213_v19 = vmul.f32 %v794_v15, %v789_v14  ;;  %v370_v20 = vmul.f32 %v365_v10, %v789_v14 }
 0x10f   :  { %v804_v21 = vmul.f32 %v317_v16, %v789_v14  ;;  %v808_v22 = vmul.f32 %v789_v14, %v742_v34  ;;  %v183_v49 = vmul.f32 %v789_v14, %v744_v40  ;;  %v262_v52 = vmul.f32 %v789_v14, %v738_v24 }
 0x110   :  { %v341_v53 = vmul.f32 %v789_v14, %v746_v57 }
 0x114   :  { %v181_v25 = vld [vmem:[#allocation2 + $0x10] sm:$0xff]  ;;  %v443_v26 = vpop.permute.xlu1 %442 }
 0x115   :  { %452 = vst.msk [vmem:[#allocation2 + $0x10] sm:$0xff] %vm159_vm6, %v445_v23  ;;  %v812_v27 = vsel %vm159_vm6, %v443_v26, %v445_v23  ;;  %v214_v28 = vmul.f32 %v755_v62, %v181_v25  ;;  %v184_v29 = vmul.f32 %v181_v25, %v744_v40  ;;  %v244_v30 = vmul.f32 %v777_v8, %v181_v25 }
 0x116   :  { %450 = vst.msk [vmem:[#allocation2] sm:$0xff] %vm164_vm4, %v443_v26  ;;  %v497_v31 = vmul.f32 %v812_v27, %v238_v13  ;;  %v823_v32 = vmul.f32 %v812_v27, %v287_v1  ;;  %v826_v35 = vmul.f32 %v812_v27, %v317_v16  ;;  %v829_v36 = vmul.f32 %v812_v27, %v365_v10 }
 0x117   :  { %222 = vrot.lane.b32.xlu1 %v214_v28, %s675_s12  ;;  %192 = vrot.lane.b32.xlu2 %v184_v29, %s674_s11  ;;  %v833_v37 = vmul.f32 %v812_v27, %v742_v34  ;;  %v263_v41 = vmul.f32 %v181_v25, %v738_v24  ;;  %v293_v44 = vmul.f32 %v753_v61, %v181_v25 }
 0x118   :  { %252 = vrot.lane.b32.xlu0 %v244_v30, %s676_s13  ;;  %v323_v47 = vmul.f32 %v768_v5, %v181_v25  ;;  %v371_v48 = vmul.f32 %v757_v63, %v181_v25  ;;  %v342_v50 = vmul.f32 %v181_v25, %v746_v57  ;;  %v461_v54 = vmul.f32 %v812_v27, %v744_v40 }
 0x119   :  { %v479_v59 = vmul.f32 %v812_v27, %v794_v15  ;;  %v569_v14 = vmul.f32 %v812_v27, %v746_v57 }
 0x11c   :  { %v459_v55 = vld [vmem:[#allocation2 + $0x10] sm:$0xff] }
 0x11d   :  { %v840_v42 = vld [vmem:[#allocation2] sm:$0xff]  ;;  %v462_v56 = vmul.f32 %v459_v55, %v744_v40  ;;  %v480_v2 = vmul.f32 %v459_v55, %v755_v62  ;;  %v498_v6 = vmul.f32 %v459_v55, %v777_v8  ;;  %v516_v62 = vmul.f32 %v459_v55, %v738_v24 }
 0x11e   :  { %v847_v34 = vmul.f32 %v840_v42, %v740_v33  ;;  %v340_v33 = vmul.f32 %v766_v4, %v746_v57  ;;  %v460_v1 = vmul.f32 %v840_v42, %v744_v40  ;;  %v478_v4 = vmul.f32 %v840_v42, %v764_v3 }
 0x11f   :  { %248 = vrot.lane.b32.xlu1 %v242_v38, %s676_s13  ;;  %218 = vrot.lane.b32.xlu2 %v212_v39, %s675_s12  ;;  %v515_v40 = vmul.f32 %v812_v27, %v738_v24  ;;  %v496_v10 = vmul.f32 %v840_v42, %v750_v60  ;;  %v514_v3 = vmul.f32 %v840_v42, %v738_v24 }
 0x120   :  { %271 = vrot.lane.b32.xlu0 %v263_v41, %s677_s14  ;;  %v534_v60 = vmul.f32 %v459_v55, %v753_v61  ;;  %v532_v12 = vmul.f32 %v840_v42, %v759_v0  ;;  %v552_v13 = vmul.f32 %v459_v55, %v768_v5  ;;  %v550_v15 = vmul.f32 %v840_v42, %v784_v11 }
 0x121   :  { %v570_v16 = vmul.f32 %v459_v55, %v746_v57  ;;  %v177_v41 = vadd.f32 %v748_v58, %v775_v7 }
 0x127   :  { %267 = vrot.lane.b32.xlu1 %v261_v43, %s677_s14  ;;  %301 = vrot.lane.b32.xlu2 %v293_v44, %s678_s15 }
 0x128   :  { %297 = vrot.lane.b32.xlu0 %v291_v45, %s678_s15 }
 0x12f   :  { %346 = vrot.lane.b32.xlu1 %v340_v33, %s679_s16  ;;  %327 = vrot.lane.b32.xlu2 %v321_v46, %s680_s17 }
 0x130   :  { %331 = vrot.lane.b32.xlu0 %v323_v47, %s680_s17 }
 0x137   :  { %379 = vrot.lane.b32.xlu2 %v371_v48, %s681_s18  ;;  %190 = vrot.lane.b32.xlu1 %v183_v49, %s674_s11 }
 0x138   :  { %350 = vrot.lane.b32.xlu0 %v342_v50, %s679_s16 }
 0x13f   :  { %250 = vrot.lane.b32.xlu2 %v243_v17, %s676_s13  ;;  %299 = vrot.lane.b32.xlu1 %v292_v18, %s678_s15  ;;  %v568_v17 = vmul.f32 %v840_v42, %v746_v57 }
 0x140   :  { %375 = vrot.lane.b32.xlu0 %v369_v51, %s681_s18 }
 0x147   :  { %269 = vrot.lane.b32.xlu2 %v262_v52, %s677_s14  ;;  %377 = vrot.lane.b32.xlu1 %v370_v20, %s681_s18  ;;  %v586_v20 = vmul.f32 %v840_v42, %v779_v9  ;;  %v178_v42 = vadd.f32 %v748_v58, %v808_v22 }
 0x148   :  { %220 = vrot.lane.b32.xlu0 %v213_v19, %s675_s12  ;;  %v588_v19 = vmul.f32 %v459_v55, %v757_v63 }
 0x14f   :  { %348 = vrot.lane.b32.xlu2 %v341_v53, %s679_s16  ;;  %468 = vrot.lane.b32.xlu1 %v461_v54, %s674_s11 }
 0x150   :  { %329 = vrot.lane.b32.xlu0 %v804_v21, %s680_s17 }
 0x157   :  { %470 = vrot.lane.b32.xlu2 %v462_v56, %s674_s11  ;;  %486 = vrot.lane.b32.xlu1 %v479_v59, %s675_s12 }
 0x158   :  { %466 = vrot.lane.b32.xlu0 %v460_v1, %s674_s11 }
 0x15f   :  { %488 = vrot.lane.b32.xlu2 %v480_v2, %s675_s12  ;;  %504 = vrot.lane.b32.xlu1 %v497_v31, %s676_s13 }
 0x160   :  { %484 = vrot.lane.b32.xlu0 %v478_v4, %s675_s12 }
 0x167   :  { %506 = vrot.lane.b32.xlu2 %v498_v6, %s676_s13  ;;  %522 = vrot.lane.b32.xlu1 %v515_v40, %s677_s14 }
 0x168   :  { %502 = vrot.lane.b32.xlu0 %v496_v10, %s676_s13 }
 0x16f   :  { %524 = vrot.lane.b32.xlu2 %v516_v62, %s677_s14  ;;  %540 = vrot.lane.b32.xlu1 %v823_v32, %s678_s15  ;;  %v189_v0 = vpop.permute.xlu0 %188 }
 0x170   :  { %520 = vrot.lane.b32.xlu0 %v514_v3, %s677_s14 }
 0x171   :  { %v193_v8 = vpop.permute.xlu2 %192 }
 0x177   :  { %542 = vrot.lane.b32.xlu2 %v534_v60, %s678_s15  ;;  %558 = vrot.lane.b32.xlu1 %v826_v35, %s680_s17 }
 0x178   :  { %538 = vrot.lane.b32.xlu0 %v532_v12, %s678_s15 }
 0x179   :  { %v219_v24 = vpop.permute.xlu2 %218 }
 0x17f   :  { %560 = vrot.lane.b32.xlu2 %v552_v13, %s680_s17  ;;  %576 = vrot.lane.b32.xlu1 %v569_v14, %s679_s16 }
 0x180   :  { %556 = vrot.lane.b32.xlu0 %v550_v15, %s680_s17 }
 0x181   :  { %v302_v61 = vpop.permute.xlu2 %301 }
 0x187   :  { %578 = vrot.lane.b32.xlu2 %v570_v16, %s679_s16  ;;  %594 = vrot.lane.b32.xlu1 %v829_v36, %s681_s18 }
 0x188   :  { %574 = vrot.lane.b32.xlu0 %v568_v17, %s679_s16 }
 0x189   :  { %v223_v5 = vpop.permute.xlu1 %222  ;;  %v328_v11 = vpop.permute.xlu2 %327 }
 0x18a   :  { %v253_v18 = vpop.permute.xlu0 %252 }
 0x18f   :  { %596 = vrot.lane.b32.xlu2 %v588_v19, %s681_s18 }
 0x190   :  { %592 = vrot.lane.b32.xlu0 %v586_v20, %s681_s18 }
 0x191   :  { %v249_v57 = vpop.permute.xlu1 %248  ;;  %v380_v21 = vpop.permute.xlu2 %379 }
 0x192   :  { %v272_v23 = vpop.permute.xlu0 %271 }
 0x199   :  { %v268_v25 = vpop.permute.xlu1 %267  ;;  %v251_v26 = vpop.permute.xlu2 %250 }
 0x19a   :  { %v298_v27 = vpop.permute.xlu0 %297  ;;  %v255_v50 = vsel %vm254_vm11, %v249_v57, %v251_v26  ;;  %v256_v7 = vsel %vm254_vm11, %v251_v26, %v253_v18 }
 0x1a1   :  { %v347_v28 = vpop.permute.xlu1 %346  ;;  %v270_v29 = vpop.permute.xlu2 %269 }
 0x1a2   :  { %v332_v30 = vpop.permute.xlu0 %331  ;;  %v274_v53 = vsel %vm273_vm12, %v268_v25, %v270_v29  ;;  %v275_v54 = vsel %vm273_vm12, %v270_v29, %v272_v23 }
 0x1a9   :  { %v191_v31 = vpop.permute.xlu1 %190  ;;  %v349_v32 = vpop.permute.xlu2 %348 }
 0x1aa   :  { %v351_v35 = vpop.permute.xlu0 %350  ;;  %v195_v9 = vsel %vm194_vm9, %v189_v0, %v191_v31  ;;  %v196_v39 = vsel %vm194_vm9, %v191_v31, %v193_v8  ;;  %v353_v60 = vsel %vm352_vm15, %v347_v28, %v349_v32 }
 0x1ab   :  { %v199_v44 = vadd.f32 %v195_v9, %v177_v41  ;;  %v200_v45 = vadd.f32 %v196_v39, %v178_v42  ;;  %v354_v12 = vsel %vm352_vm15, %v349_v32, %v351_v35 }
 0x1b1   :  { %v300_v63 = vpop.permute.xlu1 %299  ;;  %v946_v38 = vpop.permute.xlu2 %470 }
 0x1b2   :  { %v376_v36 = vpop.permute.xlu0 %375  ;;  %v304_v59 = vsel %vm303_vm13, %v298_v27, %v300_v63  ;;  %v305_v1 = vsel %vm303_vm13, %v300_v63, %v302_v61 }
 0x1b9   :  { %v378_v43 = vpop.permute.xlu1 %377  ;;  %v489_v51 = vpop.permute.xlu2 %488 }
 0x1ba   :  { %v221_v46 = vpop.permute.xlu0 %220  ;;  %v382_v14 = vsel %vm381_vm0, %v376_v36, %v378_v43  ;;  %v383_v15 = vsel %vm381_vm0, %v378_v43, %v380_v21 }
 0x1bb   :  { %v225_v33 = vsel %vm224_vm10, %v219_v24, %v221_v46  ;;  %v226_v47 = vsel %vm224_vm10, %v221_v46, %v223_v5 }
 0x1bc   :  { %v229_v48 = vadd.f32 %v225_v33, %v199_v44  ;;  %v230_v49 = vadd.f32 %v226_v47, %v200_v45 }
 0x1be   :  { %v259_v22 = vadd.f32 %v255_v50, %v229_v48  ;;  %v260_v52 = vadd.f32 %v256_v7, %v230_v49 }
 0x1c0   :  { %v278_v55 = vadd.f32 %v274_v53, %v259_v22  ;;  %v279_v56 = vadd.f32 %v275_v54, %v260_v52 }
 0x1c1   :  { %v469_v2 = vpop.permute.xlu1 %468  ;;  %v507_v61 = vpop.permute.xlu2 %506 }
 0x1c2   :  { %v330_v4 = vpop.permute.xlu0 %329  ;;  %v308_v6 = vadd.f32 %v304_v59, %v278_v55  ;;  %v309_v40 = vadd.f32 %v305_v1, %v279_v56  ;;  %v473_v28 = vsel %vm194_vm9, %v469_v2, %v946_v38 }
 0x1c3   :  { %v334_v10 = vsel %vm333_vm14, %v328_v11, %v330_v4  ;;  %v335_v62 = vsel %vm333_vm14, %v330_v4, %v332_v30  ;;  %v458_v30 = vadd.f32 %v833_v37, %v748_v58  ;;  %v457_v37 = vadd.f32 %v847_v34, %v748_v58 }
 0x1c4   :  { %v338_v3 = vadd.f32 %v334_v10, %v308_v6  ;;  %v339_v8 = vadd.f32 %v335_v62, %v309_v40 }
 0x1c5   :  { %v477_v32 = vadd.f32 %v473_v28, %v458_v30 }
 0x1c6   :  { %v357_v24 = vadd.f32 %v353_v60, %v338_v3  ;;  %v358_v13 = vadd.f32 %v354_v12, %v339_v8 }
 0x1c8   :  { %v386_v0 = vadd.f32 %v382_v14, %v357_v24  ;;  %v387_v16 = vadd.f32 %v383_v15, %v358_v13 }
 0x1c9   :  { %v487_v17 = vpop.permute.xlu1 %486  ;;  %v525_v11 = vpop.permute.xlu2 %524 }
 0x1ca   :  { %388 = vst [vmem:[%s1007_s6] sm:$0xff] %v386_v0  ;;  %v467_v5 = vpop.permute.xlu0 %466  ;;  %v491_v31 = vsel %vm224_vm10, %v487_v17, %v489_v51 }
 0x1cb   :  { %389 = vst [vmem:[%s1007_s6 + $0x8] sm:$0xff] %v387_v16  ;;  %v495_v63 = vadd.f32 %v491_v31, %v477_v32  ;;  %v472_v38 = vsel %vm194_vm9, %v467_v5, %v469_v2 }
 0x1cc   :  { %v476_v47 = vadd.f32 %v472_v38, %v457_v37 }
 0x1d1   :  { %v505_v18 = vpop.permute.xlu1 %504  ;;  %v543_v23 = vpop.permute.xlu2 %542 }
 0x1d2   :  { %v485_v19 = vpop.permute.xlu0 %484  ;;  %v509_v35 = vsel %vm254_vm11, %v505_v18, %v507_v61 }
 0x1d3   :  { %v513_v39 = vadd.f32 %v509_v35, %v495_v63  ;;  %v490_v46 = vsel %vm224_vm10, %v485_v19, %v487_v17 }
 0x1d4   :  { %v494_v7 = vadd.f32 %v490_v46, %v476_v47 }
 0x1d9   :  { %v523_v20 = vpop.permute.xlu1 %522  ;;  %v561_v26 = vpop.permute.xlu2 %560 }
 0x1da   :  { %v503_v57 = vpop.permute.xlu0 %502  ;;  %v527_v9 = vsel %vm273_vm12, %v523_v20, %v525_v11 }
 0x1db   :  { %v531_v44 = vadd.f32 %v527_v9, %v513_v39  ;;  %v508_v49 = vsel %vm254_vm11, %v503_v57, %v505_v18 }
 0x1dc   :  { %v512_v54 = vadd.f32 %v508_v49, %v494_v7 }
 0x1e1   :  { %v541_v21 = vpop.permute.xlu1 %540  ;;  %v579_v36 = vpop.permute.xlu2 %578 }
 0x1e2   :  { %v521_v25 = vpop.permute.xlu0 %520  ;;  %v545_v42 = vsel %vm303_vm13, %v541_v21, %v543_v23 }
 0x1e3   :  { %v549_v33 = vadd.f32 %v545_v42, %v531_v44  ;;  %v526_v51 = vsel %vm273_vm12, %v521_v25, %v523_v20 }
 0x1e4   :  { %v530_v59 = vadd.f32 %v526_v51, %v512_v54 }
 0x1e9   :  { %v559_v27 = vpop.permute.xlu1 %558  ;;  %v597_v22 = vpop.permute.xlu2 %596 }
 0x1ea   :  { %v539_v29 = vpop.permute.xlu0 %538  ;;  %v563_v45 = vsel %vm333_vm14, %v559_v27, %v561_v26 }
 0x1eb   :  { %v567_v50 = vadd.f32 %v563_v45, %v549_v33  ;;  %v544_v34 = vsel %vm303_vm13, %v539_v29, %v541_v21 }
 0x1ec   :  { %v548_v2 = vadd.f32 %v544_v34, %v530_v59 }
 0x1f1   :  { %v577_v41 = vpop.permute.xlu1 %576 }
 0x1f2   :  { %v557_v43 = vpop.permute.xlu0 %556  ;;  %v581_v48 = vsel %vm352_vm15, %v577_v41, %v579_v36 }
 0x1f3   :  { %v585_v52 = vadd.f32 %v581_v48, %v567_v50  ;;  %v562_v1 = vsel %vm333_vm14, %v557_v43, %v559_v27 }
 0x1f4   :  { %v566_v6 = vadd.f32 %v562_v1, %v548_v2 }
 0x1f9   :  { %v595_v53 = vpop.permute.xlu1 %594 }
 0x1fa   :  { %v575_v55 = vpop.permute.xlu0 %574  ;;  %v599_v58 = vsel %vm381_vm0, %v595_v53, %v597_v22 }
 0x1fb   :  { %v603_v56 = vadd.f32 %v599_v58, %v585_v52  ;;  %v580_v4 = vsel %vm352_vm15, %v575_v55, %v577_v41 }
 0x1fc   :  { %v584_v40 = vadd.f32 %v580_v4, %v566_v6 }
 0x1fd   :  { %621 = vst [vmem:[%s1007_s6 + $0x18] sm:$0xff] %v603_v56 }
 0x202   :  { %v593_v10 = vpop.permute.xlu0 %592 }
 0x203   :  { %v598_v62 = vsel %vm381_vm0, %v593_v10, %v595_v53 }
 0x204   :  { %v602_v3 = vadd.f32 %v598_v62, %v584_v40 }
 0x206   :  { %620 = vst [vmem:[%s1007_s6 + $0x10] sm:$0xff] %v602_v3 }

</bundles_post_ra>
